<compile_context>
chip_gen: v7x
topology: tpu7x:2x2x1
jax: 0.10.0
libtpu: 0.0.40
codegen_flags: <defaults>
</compile_context>

<pallas_src>
import functools

import jax
import jax.numpy as jnp
from jax.experimental import pallas as pl
from jax.experimental.pallas import tpu as pltpu


def _round_up(x, m):
    return (x + m - 1) // m * m


def _cdiv(a, b):
    return (a + b - 1) // b


def _tpu_generation():
    try:
        kind = jax.devices()[0].device_kind.lower()
    except Exception:
        kind = ""
    if "v7" in kind or "7x" in kind:
        return "v7x"
    if "v6" in kind:
        return "v6e"
    if "v5" in kind:
        return "v5"
    return "unknown"


# tm/tn defaults + explicit scoped-VMEM limit per generation.
_GEN_DEFAULTS = {
    "v7x":     dict(tm=512,  tn=512,  vmem_limit=48 * 1024 * 1024),   # 64 MiB physical
    "v6e":     dict(tm=1024, tn=1024, vmem_limit=96 * 1024 * 1024),   # 128 MiB physical
    "v5":      dict(tm=1024, tn=1024, vmem_limit=96 * 1024 * 1024),   # 128 MiB physical
    "unknown": dict(tm=512,  tn=512,  vmem_limit=None),               # keep compiler default
}


def _mlm_fast_kernel(x_ref, w_ref, b_ref, o_ref, m_ref, l_ref, *, tn):
    """Single pass.  Weight streamed over vocab tiles exactly once per row tile; raw logits
    staged into the resident (tm, v_pad) output block; LSE subtracted at the last tile."""
    j = pl.program_id(1)
    nj = pl.num_programs(1)

    @pl.when(j == 0)
    def _():
        m_ref[...] = jnp.full_like(m_ref, -jnp.inf)
        l_ref[...] = jnp.zeros_like(l_ref)

    col0 = pl.multiple_of(j * tn, tn)
    logits = jnp.dot(x_ref[...], w_ref[...], preferred_element_type=jnp.float32)
    logits = logits + b_ref[:, pl.ds(col0, tn)]          # bias is resident, sliced in-kernel

    m_prev = m_ref[...]
    m_new = jnp.maximum(m_prev, jnp.max(logits, axis=-1, keepdims=True))
    alpha = jnp.exp(m_prev - m_new)
    l_ref[...] = alpha * l_ref[...] + jnp.sum(jnp.exp(logits - m_new), axis=-1, keepdims=True)
    m_ref[...] = m_new

    # Stage raw logits into the resident output slab (written back to HBM only when the
    # row-tile index changes).
    o_ref[:, pl.ds(col0, tn)] = logits

    @pl.when(j == nj - 1)
    def _():
        lse = m_ref[...] + jnp.log(l_ref[...])
        o_ref[...] = o_ref[...] - lse


def _mlm_twopass_kernel(x_ref, w_ref, b_ref, o_ref, m_ref, l_ref, lse_ref, *, tn):
    """Two passes over the vocab per row tile (for vocab too large to keep resident):
    pass 0 accumulates the online log-sum-exp, pass 1 recomputes logits and writes output."""
    p = pl.program_id(1)   # 0 = LSE accumulation, 1 = output
    j = pl.program_id(2)   # vocab tile

    col0 = pl.multiple_of(j * tn, tn)
    logits = jnp.dot(x_ref[...], w_ref[...], preferred_element_type=jnp.float32)
    logits = logits + b_ref[:, pl.ds(col0, tn)]

    @pl.when((p == 0) & (j == 0))
    def _():
        m_ref[...] = jnp.full_like(m_ref, -jnp.inf)
        l_ref[...] = jnp.zeros_like(l_ref)

    @pl.when(p == 0)
    def _():
        m_prev = m_ref[...]
        m_new = jnp.maximum(m_prev, jnp.max(logits, axis=-1, keepdims=True))
        alpha = jnp.exp(m_prev - m_new)
        # TODO(synk): on v6e/v7x the exp could run in bf16 on the EUP (~2x transcendental
        # throughput); keep f32 until a bundle dump shows EUP is the binding slot.
        l_ref[...] = alpha * l_ref[...] + jnp.sum(jnp.exp(logits - m_new), axis=-1,
                                                  keepdims=True)
        m_ref[...] = m_new

    @pl.when((p == 1) & (j == 0))
    def _():
        # Hoisted LSE: computed once per row tile instead of once per vocab tile.
        lse_ref[...] = m_ref[...] + jnp.log(l_ref[...])

    @pl.when(p == 1)
    def _():
        o_ref[...] = (logits - lse_ref[...]).astype(o_ref.dtype)


def masked_language_model(x, weight, bias, *, tm=None, tn=None, path="auto",
                          vmem_limit_bytes=None):
    """
    x:      (batch, seq, hidden) float32 (or bf16)
    weight: (hidden, vocab)              (PyTorch nn.Linear.weight transposed)
    bias:   (vocab,)
    returns (batch, seq, vocab) float32 log-probabilities
    """
    batch, seq, hidden = x.shape
    vocab = weight.shape[1]
    M = batch * seq

    gen = _tpu_generation()
    d = _GEN_DEFAULTS[gen]
    tm = d["tm"] if tm is None else tm
    tn = d["tn"] if tn is None else tn
    vmem_limit_bytes = d["vmem_limit"] if vmem_limit_bytes is None else vmem_limit_bytes

    # Row tile: clamp to the 8-aligned problem size.
    m_aligned = _round_up(M, 8)
    tm = _round_up(min(tm, m_aligned), 8)
    # v7x megacore: keep >= 2 row tiles when rows allow so the second TensorCore works.
    if gen == "v7x" and _cdiv(m_aligned, tm) < 2 and m_aligned >= 16:
        tm = _round_up(_cdiv(m_aligned, 2), 8)

    # Vocab tile: multiple of 128, clamped to the padded vocab.
    tn = _round_up(min(tn, _round_up(vocab, 128)), 128)

    budget = int(0.85 * vmem_limit_bytes) if vmem_limit_bytes else 12 * 1024 * 1024

    def fast_bytes(tm_, tn_):
        v_pad_ = _round_up(vocab, tn_)
        return (2 * tm_ * hidden * 2      # x bf16, double-buffered
                + 2 * hidden * tn_ * 2    # weight bf16, double-buffered
                + 2 * v_pad_ * 4          # resident bias
                + 2 * tm_ * v_pad_ * 4    # resident f32 logits/output slab
                + 2 * tm_ * 4)            # m, l scratch

    def twopass_bytes(tm_, tn_):
        v_pad_ = _round_up(vocab, tn_)
        return (2 * tm_ * hidden * 2 + 2 * hidden * tn_ * 2 + 2 * v_pad_ * 4
                + 2 * tm_ * tn_ * 4 + 3 * tm_ * 4)

    if path == "auto":
        # Take the single-stream fast path only if it fits at the chosen tm; never shrink
        # tm to force it (weight HBM traffic scales as 1/tm).
        path = "fast" if fast_bytes(tm, tn) <= budget else "twopass"
    if path == "twopass":
        while twopass_bytes(tm, tn) > budget and tn > 128:
            tn = _round_up(max(128, tn // 2), 128)
        while twopass_bytes(tm, tn) > budget and tm > 8:
            tm = _round_up(max(8, tm // 2), 8)

    m_pad = _round_up(M, tm)
    v_pad = _round_up(vocab, tn)

    # bf16 operands for the MXU; softmax / accumulation stay f32 inside the kernel.
    x2d = x.reshape(M, hidden)
    if x2d.dtype != jnp.bfloat16:
        x2d = x2d.astype(jnp.bfloat16)
    w = weight if weight.dtype == jnp.bfloat16 else weight.astype(jnp.bfloat16)
    b = bias.astype(jnp.float32)

    # Pad rows with zeros (sliced off below); pad vocab columns with bias = -1e30 so padded
    # classes contribute ~0 to the log-sum-exp.
    if m_pad != M:
        x2d = jnp.pad(x2d, ((0, m_pad - M), (0, 0)))
    if v_pad != vocab:
        w = jnp.pad(w, ((0, 0), (0, v_pad - vocab)))
        b = jnp.pad(b, (0, v_pad - vocab), constant_values=-1e30)
    b = b.reshape(1, v_pad)

    cp_kwargs = {}
    if vmem_limit_bytes:
        cp_kwargs["vmem_limit_bytes"] = int(vmem_limit_bytes)

    if path == "fast":
        grid = (m_pad // tm, v_pad // tn)
        out = pl.pallas_call(
            functools.partial(_mlm_fast_kernel, tn=tn),
            out_shape=jax.ShapeDtypeStruct((m_pad, v_pad), jnp.float32),
            grid_spec=pltpu.PrefetchScalarGridSpec(
                num_scalar_prefetch=0,
                grid=grid,
                in_specs=[
                    pl.BlockSpec((tm, hidden), lambda i, j: (i, 0)),   # activations row tile
                    pl.BlockSpec((hidden, tn), lambda i, j: (0, j)),   # weight streamed once
                    pl.BlockSpec((1, v_pad),   lambda i, j: (0, 0)),   # bias resident
                ],
                # Same output block across the vocab axis -> resident slab, one HBM write.
                out_specs=pl.BlockSpec((tm, v_pad), lambda i, j: (i, 0)),
                scratch_shapes=[
                    pltpu.VMEM((tm, 1), jnp.float32),   # running max
                    pltpu.VMEM((tm, 1), jnp.float32),   # running sum of exp
                ],
            ),
            compiler_params=pltpu.CompilerParams(
                dimension_semantics=("parallel", "arbitrary"), **cp_kwargs),
        )(x2d, w, b)
    else:
        grid = (m_pad // tm, 2, v_pad // tn)
        out = pl.pallas_call(
            functools.partial(_mlm_twopass_kernel, tn=tn),
            out_shape=jax.ShapeDtypeStruct((m_pad, v_pad), jnp.float32),
            grid_spec=pltpu.PrefetchScalarGridSpec(
                num_scalar_prefetch=0,
                grid=grid,
                in_specs=[
                    pl.BlockSpec((tm, hidden), lambda i, p, j: (i, 0)),
                    pl.BlockSpec((hidden, tn), lambda i, p, j: (0, j)),
                    pl.BlockSpec((1, v_pad),   lambda i, p, j: (0, 0)),   # bias resident
                ],
                # During pass 0 keep pointing at block (i, 0) so no garbage tile is stored;
                # pass 1 visits and stores every (i, j).
                out_specs=pl.BlockSpec((tm, tn), lambda i, p, j: (i, j * p)),
                scratch_shapes=[
                    pltpu.VMEM((tm, 1), jnp.float32),   # running max
                    pltpu.VMEM((tm, 1), jnp.float32),   # running sum of exp
                    pltpu.VMEM((tm, 1), jnp.float32),   # hoisted LSE
                ],
            ),
            compiler_params=pltpu.CompilerParams(
                dimension_semantics=("parallel", "arbitrary", "arbitrary"), **cp_kwargs),
        )(x2d, w, b)

    return out[:M, :vocab].reshape(batch, seq, vocab)


def _reference(x, weight, bias):
    # Reference with matching bf16 matmul precision (f32 accumulation).
    logits = jnp.einsum(
        "bsh,hv->bsv",
        x.astype(jnp.bfloat16), weight.astype(jnp.bfloat16),
        preferred_element_type=jnp.float32) + bias
    return jax.nn.log_softmax(logits, axis=-1)


if __name__ == "__main__":
    # --- Test 1: module shapes (hidden=32, vocab=128, batch=2, seq=8), auto path ---
    batch, seq, hidden, vocab = 2, 8, 32, 128
    kx, kw, kb = jax.random.split(jax.random.PRNGKey(0), 3)
    x = jax.random.normal(kx, (batch, seq, hidden), dtype=jnp.float32)
    weight = jax.random.normal(kw, (hidden, vocab), dtype=jnp.float32) * 0.02
    bias = jax.random.normal(kb, (vocab,), dtype=jnp.float32) * 0.02

    out = jax.jit(masked_language_model)(x, weight, bias)
    jax.block_until_ready(out)
    assert out.shape == (batch, seq, vocab)

    ref = _reference(x, weight, bias)
    assert jnp.allclose(out, ref, atol=2e-3, rtol=2e-3), float(jnp.max(jnp.abs(out - ref)))
    # Looser sanity check against the full-f32 module semantics.
    ref_f32 = jax.nn.log_softmax(jnp.einsum("bsh,hv->bsv", x, weight) + bias, axis=-1)
    assert jnp.allclose(out, ref_f32, atol=5e-2, rtol=5e-2)

    # --- Test 2: multi-tile rows + ragged vocab, both paths (exercises the multi-tile
    #     online LSE, the -1e30 vocab-padding path, and the (i, j*p) output-spec trick) ---
    batch2, seq2, hidden2, vocab2 = 2, 24, 32, 300   # M=48 rows; vocab pads to 384
    kx2, kw2, kb2 = jax.random.split(jax.random.PRNGKey(1), 3)
    x2 = jax.random.normal(kx2, (batch2, seq2, hidden2), dtype=jnp.float32)
    w2 = jax.random.normal(kw2, (hidden2, vocab2), dtype=jnp.float32) * 0.02
    b2 = jax.random.normal(kb2, (vocab2,), dtype=jnp.float32) * 0.02
    ref2 = _reference(x2, w2, b2)
    for forced in ("fast", "twopass"):
        f = jax.jit(functools.partial(masked_language_model, tm=16, tn=128, path=forced))
        out2 = f(x2, w2, b2)
        jax.block_until_ready(out2)
        assert out2.shape == (batch2, seq2, vocab2)
        assert jnp.allclose(out2, ref2, atol=2e-3, rtol=2e-3), (
            forced, float(jnp.max(jnp.abs(out2 - ref2))))

    print("KERNEL_OK")
</pallas_src>

<mosaic_0001>
module attributes {stable_mosaic.version = 11 : i64} {
  func.func @_mlm_fast_kernel(%arg0: i32, %arg1: i32, %arg2: memref<16x32xbf16, #tpu.memory_space<vmem>>, %arg3: memref<32x128xbf16, #tpu.memory_space<vmem>>, %arg4: memref<1x128xf32, #tpu.memory_space<vmem>>, %arg5: memref<16x128xf32, #tpu.memory_space<vmem>>, %arg6: memref<16x1xf32, #tpu.memory_space<vmem>>, %arg7: memref<16x1xf32, #tpu.memory_space<vmem>>) attributes {dimension_semantics = [#tpu.dimension_semantics<parallel>, #tpu.dimension_semantics<arbitrary>], iteration_bounds = array<i64: 1, 1>, scalar_prefetch = 0 : i64, scratch_operands = 2 : i64, tpu.core_type = #tpu.core_type<tc>, window_params = [{transform_indices = @transform_0, window_bounds = array<i64: 16, 32>}, {transform_indices = @transform_1, window_bounds = array<i64: 32, 128>}, {pipeline_mode = #tpu.pipeline_mode<synchronous>, transform_indices = @transform_2, window_bounds = array<i64: 1, 128>}, {transform_indices = @transform_3, window_bounds = array<i64: 16, 128>}]} {
    %c0_i32 = arith.constant 0 : i32
    %0 = arith.cmpi eq, %arg1, %c0_i32 : i32
    %1 = arith.extui %0 : i1 to i32
    %c0_i32_0 = arith.constant 0 : i32
    %2 = arith.cmpi ne, %1, %c0_i32_0 : i32
    scf.if %2 {
      %cst_18 = arith.constant 0xFF800000 : f32
      %33 = vector.broadcast %cst_18 : f32 to vector<16x1xf32>
      %c0_19 = arith.constant 0 : index
      %c0_20 = arith.constant 0 : index
      %34 = vector.load %arg6[%c0_19, %c0_20] : memref<16x1xf32, #tpu.memory_space<vmem>>, vector<16x1xf32>
      tpu.vector_store %arg6[%c0_19, %c0_20], %33 {strides = array<i32>} : memref<16x1xf32, #tpu.memory_space<vmem>>, vector<16x1xf32>,
      %cst_21 = arith.constant 0.000000e+00 : f32
      %35 = vector.broadcast %cst_21 : f32 to vector<16x1xf32>
      %c0_22 = arith.constant 0 : index
      %c0_23 = arith.constant 0 : index
      %36 = vector.load %arg7[%c0_22, %c0_23] : memref<16x1xf32, #tpu.memory_space<vmem>>, vector<16x1xf32>
      tpu.vector_store %arg7[%c0_22, %c0_23], %35 {strides = array<i32>} : memref<16x1xf32, #tpu.memory_space<vmem>>, vector<16x1xf32>,
    } else {
    }
    %c128_i32 = arith.constant 128 : i32
    %3 = arith.muli %arg1, %c128_i32 : i32
    %4 = tpu.assume_multiple %3, 128 : i32
    %c0 = arith.constant 0 : index
    %c0_1 = arith.constant 0 : index
    %5 = vector.load %arg2[%c0, %c0_1] : memref<16x32xbf16, #tpu.memory_space<vmem>>, vector<16x32xbf16>
    %c0_2 = arith.constant 0 : index
    %c0_3 = arith.constant 0 : index
    %6 = vector.load %arg3[%c0_2, %c0_3] : memref<32x128xbf16, #tpu.memory_space<vmem>>, vector<32x128xbf16>
    %cst = arith.constant dense<0.000000e+00> : vector<16x128xf32>
    %7 = tpu.matmul %5, %6, %cst {dimension_numbers = #tpu.dot_dimension_numbers<[1], [0], [0], [1], [0, 0, 1, 1], [], []>} : vector<16x32xbf16>, vector<32x128xbf16>, vector<16x128xf32> -> vector<16x128xf32>
    %c0_4 = arith.constant 0 : index
    %8 = arith.index_cast %4 : i32 to index
    %9 = vector.load %arg4[%c0_4, %8] : memref<1x128xf32, #tpu.memory_space<vmem>>, vector<1x128xf32>
    %10 = vector.broadcast %9 : vector<1x128xf32> to vector<16x128xf32>
    %11 = arith.addf %7, %10 : vector<16x128xf32>
    %c0_5 = arith.constant 0 : index
    %c0_6 = arith.constant 0 : index
    %12 = vector.load %arg6[%c0_5, %c0_6] : memref<16x1xf32, #tpu.memory_space<vmem>>, vector<16x1xf32>
    %cst_7 = arith.constant dense<0xFF800000> : vector<16xf32>
    %13 = vector.multi_reduction <maximumf>, %11, %cst_7 [1] : vector<16x128xf32> to vector<16xf32>
    %14 = vector.shape_cast %13 : vector<16xf32> to vector<16x1xf32>
    %15 = arith.maximumf %12, %14 : vector<16x1xf32>
    %16 = arith.subf %12, %15 : vector<16x1xf32>
    %17 = math.exp %16 : vector<16x1xf32>
    %c0_8 = arith.constant 0 : index
    %c0_9 = arith.constant 0 : index
    %18 = vector.load %arg7[%c0_8, %c0_9] : memref<16x1xf32, #tpu.memory_space<vmem>>, vector<16x1xf32>
    %19 = arith.mulf %17, %18 : vector<16x1xf32>
    %20 = vector.broadcast %15 : vector<16x1xf32> to vector<16x128xf32>
    %21 = arith.subf %11, %20 : vector<16x128xf32>
    %22 = math.exp %21 : vector<16x128xf32>
    %cst_10 = arith.constant dense<0.000000e+00> : vector<16xf32>
    %23 = vector.multi_reduction <add>, %22, %cst_10 [1] : vector<16x128xf32> to vector<16xf32>
    %24 = vector.shape_cast %23 : vector<16xf32> to vector<16x1xf32>
    %25 = arith.addf %19, %24 : vector<16x1xf32>
    %c0_11 = arith.constant 0 : index
    %c0_12 = arith.constant 0 : index
    %26 = vector.load %arg7[%c0_11, %c0_12] : memref<16x1xf32, #tpu.memory_space<vmem>>, vector<16x1xf32>
    tpu.vector_store %arg7[%c0_11, %c0_12], %25 {strides = array<i32>} : memref<16x1xf32, #tpu.memory_space<vmem>>, vector<16x1xf32>,
    %c0_13 = arith.constant 0 : index
    %c0_14 = arith.constant 0 : index
    %27 = vector.load %arg6[%c0_13, %c0_14] : memref<16x1xf32, #tpu.memory_space<vmem>>, vector<16x1xf32>
    tpu.vector_store %arg6[%c0_13, %c0_14], %15 {strides = array<i32>} : memref<16x1xf32, #tpu.memory_space<vmem>>, vector<16x1xf32>,
    %c0_15 = arith.constant 0 : index
    %28 = arith.index_cast %4 : i32 to index
    %29 = vector.load %arg5[%c0_15, %28] : memref<16x128xf32, #tpu.memory_space<vmem>>, vector<16x128xf32>
    tpu.vector_store %arg5[%c0_15, %28], %11 {strides = array<i32>} : memref<16x128xf32, #tpu.memory_space<vmem>>, vector<16x128xf32>,
    %c0_i32_16 = arith.constant 0 : i32
    %30 = arith.cmpi eq, %arg1, %c0_i32_16 : i32
    %31 = arith.extui %30 : i1 to i32
    %c0_i32_17 = arith.constant 0 : i32
    %32 = arith.cmpi ne, %31, %c0_i32_17 : i32
    scf.if %32 {
      %c0_18 = arith.constant 0 : index
      %c0_19 = arith.constant 0 : index
      %33 = vector.load %arg6[%c0_18, %c0_19] : memref<16x1xf32, #tpu.memory_space<vmem>>, vector<16x1xf32>
      %c0_20 = arith.constant 0 : index
      %c0_21 = arith.constant 0 : index
      %34 = vector.load %arg7[%c0_20, %c0_21] : memref<16x1xf32, #tpu.memory_space<vmem>>, vector<16x1xf32>
      %35 = math.log %34 : vector<16x1xf32>
      %36 = arith.addf %33, %35 : vector<16x1xf32>
      %c0_22 = arith.constant 0 : index
      %c0_23 = arith.constant 0 : index
      %37 = vector.load %arg5[%c0_22, %c0_23] : memref<16x128xf32, #tpu.memory_space<vmem>>, vector<16x128xf32>
      %38 = vector.broadcast %36 : vector<16x1xf32> to vector<16x128xf32>
      %39 = arith.subf %37, %38 : vector<16x128xf32>
      %c0_24 = arith.constant 0 : index
      %c0_25 = arith.constant 0 : index
      %40 = vector.load %arg5[%c0_24, %c0_25] : memref<16x128xf32, #tpu.memory_space<vmem>>, vector<16x128xf32>
      tpu.vector_store %arg5[%c0_24, %c0_25], %39 {strides = array<i32>} : memref<16x128xf32, #tpu.memory_space<vmem>>, vector<16x128xf32>,
    } else {
    }
    return
  }
  func.func @transform_0(%arg0: i32, %arg1: i32) -> (i32, i32) {
    %c0_i32 = arith.constant 0 : i32
    %c0_i32_0 = arith.constant 0 : i32
    return %arg0, %c0_i32 : i32, i32
  }
  func.func @transform_1(%arg0: i32, %arg1: i32) -> (i32, i32) {
    %c0_i32 = arith.constant 0 : i32
    %c0_i32_0 = arith.constant 0 : i32
    return %c0_i32, %arg1 : i32, i32
  }
  func.func @transform_2(%arg0: i32, %arg1: i32) -> (i32, i32) {
    %c0_i32 = arith.constant 0 : i32
    %c0_i32_0 = arith.constant 0 : i32
    %c0_i32_1 = arith.constant 0 : i32
    return %c0_i32, %c0_i32_0 : i32, i32
  }
  func.func @transform_3(%arg0: i32, %arg1: i32) -> (i32, i32) {
    %c0_i32 = arith.constant 0 : i32
    %c0_i32_0 = arith.constant 0 : i32
    return %arg0, %c0_i32 : i32, i32
  }
}

</mosaic_0001>

<bundles_post_ra>
// kernel: masked_language_model.1
= control target key start
LH: loop header
LB: loop body
LE: loop exit
PB: predicated region body
PF: predicated region fallthrough
CT: control target
= control target key end

     0   :  { %v263_v1 = vmov 0.0   ;;  %vm264_vm0 = vmmov 0   ;;  %s332_s0 = inlined_call_operand.vmem [shape: bf16[16,32], index: 0, kind: input, shape index: {}]   ;;  %s333_s1 = inlined_call_operand.vmem [shape: bf16[32,128], index: 1, kind: input, shape index: {}]   ;;  %s334_s2 = inlined_call_operand.vmem [shape: f32[1,128], index: 2, kind: input, shape index: {}]   ;;  %s335_s3 = inlined_call_operand.hbm [shape: f32[16,128], index: 3, kind: output, shape index: {}]  }
   0x1   :  { %v224_v0 = vld [vmem:[%s333_s1] sm:$0xff]   ;;  %207 = vmatprep.subr.bf16.mxu0 %v263_v1  ;;  %v225_v2 = vld [vmem:[%s333_s1 + $0x8] sm:$0xff]   ;;  %211 = vmatprep.mubr.msk.bf16.mxu0 %vm264_vm0, %v263_v1 }
   0x2   :  { %208 = vmatpush3.bf16.msra.mxu0 %v224_v0 }
   0x3   :  { %209 = vmatprep.subr.bf16.mxu0 %v263_v1 }
   0x4   :  { %8 = vsyncpa [#allocation5], 0  ;;  %v226_v3 = vld [vmem:[%s332_s0] sm:$0xff]   ;;  %vm59_vm1 = vcmask 261120   ;;  %vm20_vm2 = vcmask 7168   ;;  %v265_v11 = vmov -inf  }
   0x5   :  { %v199_v4 = vld [vmem:[%s334_s2] ss:$0 sm:$0xff]  ;;  %21 = vst.msk [vmem:[#allocation2] sm:$0xff] %vm20_vm2, %v265_v11  ;;  %22 = vst.msk [vmem:[#allocation2 + $0x8] sm:$0xff] %vm20_vm2, %v265_v11  ;;  %v266_v12 = vmov 0   ;;  %s267_s0 = smov [#allocation4]  }
   0x6   :  { %210 = vmatpush3.bf16.msra.mxu0 %v225_v2  ;;  %23 = vst.msk [vmem:[#allocation3] sm:$0xff] %vm20_vm2, %v263_v1  ;;  %24 = vst.msk [vmem:[#allocation3 + $0x8] sm:$0xff] %vm20_vm2, %v263_v1  ;;  %222 = vset.pattern.permute.xlu1 %v266_v12  ;;  %s186_s1 = sshll.u32 %s267_s0, 4  ;;  %s187_s1 = int_to_ptr.vmem [resolvable:$true] %s186_s1 }
   0x7   :  { %223 = vset.pattern.permute.xlu0 %v266_v12  ;;  %s239_s2 = scalar_lea.vmem %s187_s1, 256  ;;  %p244_p1 = scmp.lt.s32.totalorder %s187_s1, %s187_s1 }
   0x8   :  { %p240_p0 = scmp.ne.s32.totalorder %s187_s1, %s239_s2  ;;  %p245_p2 = scmp.lt.s32.totalorder %s239_s2, %s239_s2 }
   0x9   :  { %212 = vmatmul.mubr.msk.bf16.vlgmr.msra.gmra.mrb[0].mxu0 %vm59_vm1, %v226_v3 }
   0xa   :  { %p246_p3 = por %p245_p2, %p244_p1 }
   0xc   :  { %v104_v13 = vld [vmem:[#allocation2] sm:$0xff]  ;;  %v105_v16 = vld [vmem:[#allocation2 + $0x8] sm:$0xff]  ;;  %p247_p4 = pnand %p246_p3, %p240_p0 }
   0xd   :  { %v118_v32 = vld [vmem:[#allocation3] sm:$0xff]  ;;  %v119_v36 = vld [vmem:[#allocation3 + $0x8] sm:$0xff] }
  0xdc   :  { %v97_v5 = vpop.f32.mrb[0].mxu0 }
  0xdd   :  { %v302_v6 = vadd.f32 %v199_v4, %v97_v5  ;;  %v213_v7 = vpop.f32.mrb[1].mxu0 }
  0xde   :  { %v100_v8 = vpop.f32.mrb[2].mxu0 }
  0xdf   :  { %106 = vmax.xlane.f32.xlu0 %v302_v6  ;;  %v214_v9 = vpop.f32.mrb[3].mxu0  ;;  %v305_v10 = vadd.f32 %v199_v4, %v100_v8 }
  0xe3   :  { %108 = vmax.xlane.f32.xlu0 %v305_v10 }
 0x16c   :  { %v107_v14 = vpop.xlane.xlu0 %106 }
 0x16d   :  { %v110_v15 = vmax.f32 %v104_v13, %v107_v14 }
 0x16f   :  { %v112_v17 = vsub.f32 %v104_v13, %v110_v15  ;;  %147 = vst.msk [vmem:[#allocation2] sm:$0xff] %vm20_vm2, %v110_v15  ;;  %124 = vperm.xlu1 %222, %v110_v15  }
 0x170   :  { %v109_v18 = vpop.xlane.xlu0 %108 }
 0x171   :  { %v111_v19 = vmax.f32 %v105_v16, %v109_v18  ;;  %v114_v29 = vmul.f32 1.442695, %v112_v17 }
 0x173   :  { %v113_v20 = vsub.f32 %v105_v16, %v111_v19  ;;  %148 = vst.msk [vmem:[#allocation2 + $0x8] sm:$0xff] %vm20_vm2, %v111_v19  ;;  %129 = vperm.xlu1 %222, %v111_v19  }
 0x175   :  { %v116_v30 = vmul.f32 1.442695, %v113_v20 }
 0x176   :  { %v155_v45 = vld [vmem:[#allocation2] sm:$0xff] }
 0x17a   :  { %v156_v49 = vld [vmem:[#allocation2 + $0x8] sm:$0xff] }
 0x1ee   :  { %v125_v21 = vpop.permute.xlu1 %124 }
 0x1ef   :  { %v132_v22 = vsub.f32 %v302_v6, %v125_v21 }
 0x1f1   :  { %v134_v23 = vmul.f32 1.442695, %v132_v22 }
 0x1f2   :  { %v130_v24 = vpop.permute.xlu1 %129 }
 0x1f3   :  { %227 = vpow2.f32 %v134_v23  ;;  %v133_v25 = vsub.f32 %v305_v10, %v130_v24 }
 0x1f5   :  { %v136_v26 = vmul.f32 1.442695, %v133_v25 }
 0x1f7   :  { %229 = vpow2.f32 %v136_v26 }
 0x1f8   :  { %231 = vpow2.f32 %v114_v29 }
 0x1f9   :  { %233 = vpow2.f32 %v116_v30 }
 0x1fd   :  { %v228_v27 = vpop.eup %227 }
 0x1fe   :  { %138 = vadd.xlane.f32.xlu0 %v228_v27 }
 0x201   :  { %v230_v28 = vpop.eup %229 }
 0x202   :  { %140 = vadd.xlane.f32.xlu1 %v230_v28  ;;  %v232_v31 = vpop.eup %231 }
 0x203   :  { %v120_v33 = vmul.f32 %v232_v31, %v118_v32  ;;  %v234_v34 = vpop.eup %233 }
 0x204   :  { %v121_v38 = vmul.f32 %v234_v34, %v119_v36 }
 0x28b   :  { %v139_v35 = vpop.xlane.xlu0 %138 }
 0x28c   :  { %v142_v37 = vadd.f32 %v139_v35, %v120_v33 }
 0x28e   :  { %145 = vst.msk [vmem:[#allocation3] sm:$0xff] %vm20_vm2, %v142_v37 }
 0x28f   :  { %v141_v39 = vpop.xlane.xlu1 %140 }
 0x290   :  { %v143_v40 = vadd.f32 %v141_v39, %v121_v38 }
 0x292   :  { %146 = vst.msk [vmem:[#allocation3 + $0x8] sm:$0xff] %vm20_vm2, %v143_v40 }
 0x295   :  { %v157_v41 = vld [vmem:[#allocation3] sm:$0xff] }
 0x296   :  { %235 = vlog2.f32 %v157_v41 }
 0x299   :  { %v158_v42 = vld [vmem:[#allocation3 + $0x8] sm:$0xff] }
 0x29a   :  { %237 = vlog2.f32 %v158_v42 }
 0x2a0   :  { %v236_v43 = vpop.eup %235 }
 0x2a1   :  { %v160_v44 = vmul.f32 0.6931472, %v236_v43 }
 0x2a3   :  { %v163_v46 = vadd.f32 %v160_v44, %v155_v45 }
 0x2a4   :  { %v238_v47 = vpop.eup %237 }
 0x2a5   :  { %169 = vperm.xlu0 %223, %v163_v46   ;;  %v162_v48 = vmul.f32 0.6931472, %v238_v47 }
 0x2a7   :  { %v164_v50 = vadd.f32 %v162_v48, %v156_v49 }
 0x2a9   :  { %174 = vperm.xlu1 %222, %v164_v50  }
 0x324   :  { %v170_v51 = vpop.permute.xlu0 %169 }
 0x325   :  { %v177_v52 = vsub.f32 %v302_v6, %v170_v51 }
 0x327   :  { %179 = vst [vmem:[#allocation4] sm:$0xff] %v177_v52 }
 0x328   :  { %v175_v53 = vpop.permute.xlu1 %174 }
 0x329   :  { %v178_v54 = vsub.f32 %v305_v10, %v175_v53 }
 0x32b   :  { %180 = vst [vmem:[#allocation4 + $0x8] sm:$0xff] %v178_v54 }
 0x32c   :  { %250 = shalt.err (!%p247_p4)
}
 0x32d   :  { %s251_s22 = scalar_lea.hbm %s335_s3, 256 }
 0x32e   :  { %p252_p5 = scmp.ne.s32.totalorder %s335_s3, %s251_s22  ;;  %p255_p6 = scmp.lt.u32.totalorder %s251_s22, %s335_s3 }
 0x330   :  { %p257_p7 = pnand %p255_p6, %p252_p5 }
 0x332   :  { %260 = shalt.err (!%p257_p7)
}
 0x333   :  { %s268_s27 = smov 128   ;;  %s269_s28 = smov 8  }
 0x334   :  { %192 = dma.vmem_to_hbm [thread:$0]  %s187_s1, 256, %s335_s3, [#allocation5], %s268_s27, %s268_s27, %s269_s28  }
 0x335   :  { %261 = dma.done.wait [#allocation5], 256  }
 0x336   :  { %262 = vsyncadd [#allocation5], 4294967040 }
 0x337   :  { %196 = vsyncpa [#allocation5], 1 }

</bundles_post_ra>
